<compile_context>
chip_gen: v6e
topology: v6e:2x2x1
jax: 0.10.0
libtpu: 0.0.40
codegen_flags: <defaults>
</compile_context>

<pallas_src>
import functools

import jax
import jax.numpy as jnp
from jax import lax
from jax.experimental import pallas as pl
from jax.experimental.pallas import tpu as pltpu


def _round_up(n, m):
    return ((n + m - 1) // m) * m


def intent_classifier_kernel(x_ref, w_ref, b_ref, o_ref):
    """out = dropout(x, p=0.0) @ W.T + b  ==  x @ W.T + b."""
    # Dropout with rate 0.0 is the identity (module default / eval) -> no-op.
    x = x_ref[...]                       # [TM, D]  (caller dtype)
    w = w_ref[...]                       # [LP, D]  (compute dtype, torch layout)
    # Cast x to the weight's compute dtype on the VPU (no extra HBM pass) and
    # contract dim 1 of both operands on the MXU with f32 accumulation -> no
    # HBM-side transpose of the torch-layout weight is ever materialized.
    acc = lax.dot_general(
        x.astype(w.dtype), w,
        dimension_numbers=(((1,), (1,)), ((), ())),
        preferred_element_type=jnp.float32,
    )
    o_ref[...] = (acc + b_ref[...]).astype(o_ref.dtype)   # bias add in f32


def prepare_params(weight, bias, *, compute_dtype=jnp.bfloat16, lane_multiple=128):
    """One-time (init-time) parameter prep: pad labels to a lane-dense multiple
    of 128 and cast the weight to the MXU compute dtype.

    weight: [L, D] (torch nn.Linear layout), bias: [L].
    Returns (w_padded [LP, D] compute_dtype, b_padded [1, LP] float32).
    """
    L, D = weight.shape
    # NOTE: for configs with L > 128 on v6e/v7x, use lane_multiple=256 (MXU
    # N-width); 128 matches v5e and small-L heads.
    LP = _round_up(max(L, lane_multiple), lane_multiple)
    w_p = jnp.zeros((LP, D), compute_dtype).at[:L, :].set(weight.astype(compute_dtype))
    b_p = jnp.zeros((1, LP), jnp.float32).at[0, :L].set(bias.astype(jnp.float32))
    # TODO(synk): if the real hidden size D is not a multiple of 128 (here 32),
    # also pad D once at init (zero features are exact) so x loads are
    # lane-dense; left unpadded here to avoid a per-call pass over x.
    return w_p, b_p


def _choose_tm(batch, block_m):
    """Batch tile: big enough to amortize per-step overhead, >= 2 grid steps
    for mid-size batches (v7x has 2 TensorCores), sublane-aligned."""
    if batch <= 16:
        return _round_up(max(batch, 8), 8)     # single tiny block
    tm = min(block_m, _round_up(pl.cdiv(batch, 2), 16))
    return max(tm, 16)


@functools.partial(jax.jit, static_argnames=("block_m",))
def intent_classifier_padded(x, w_padded, b_padded, *, block_m=512):
    """Per-call path. x: [B, D]; w_padded: [LP, D]; b_padded: [1, LP].
    Returns lane-dense padded logits [B, LP] in x.dtype."""
    B, D = x.shape
    LP, Dw = w_padded.shape
    assert D == Dw, "hidden dim mismatch between x and padded weight"

    TM = _choose_tm(B, block_m)
    grid = (pl.cdiv(B, TM),)
    out_dtype = x.dtype

    # Explicit VMEM budget: double-buffered x/out tiles + resident weight/bias
    # blocks (+ headroom for Mosaic internal scratch). Matters once TM is big
    # on v5e (16 MiB scoped default) and on v7x (64 MiB physical VMEM).
    x_b = x.dtype.itemsize
    w_b = w_padded.dtype.itemsize
    o_b = jnp.dtype(out_dtype).itemsize
    vmem_budget = (2 * TM * D * x_b + 2 * TM * LP * o_b
                   + 2 * LP * D * w_b + 2 * LP * 4)
    vmem_limit = int(min(vmem_budget + (8 << 20), 100 << 20))

    cost = pl.CostEstimate(
        flops=2 * B * D * LP,
        transcendentals=0,
        bytes_accessed=B * D * x_b + LP * D * w_b + LP * 4 + B * LP * o_b,
    )

    # NOTE: for very large LP*D, add pipeline_mode=pl.Buffered(1) to the
    # weight/bias specs (constant index_map) to halve their VMEM footprint;
    # at these sizes the resident blocks are a few KiB so the default is kept
    # for portability.
    return pl.pallas_call(
        intent_classifier_kernel,
        out_shape=jax.ShapeDtypeStruct((B, LP), out_dtype),
        grid_spec=pl.GridSpec(
            grid=grid,
            in_specs=[
                pl.BlockSpec((TM, D), lambda i: (i, 0)),    # x: tiled over batch
                pl.BlockSpec((LP, D), lambda i: (0, 0)),    # weight: resident
                pl.BlockSpec((1, LP), lambda i: (0, 0)),    # bias: resident
            ],
            out_specs=pl.BlockSpec((TM, LP), lambda i: (i, 0)),
        ),
        compiler_params=pltpu.CompilerParams(
            dimension_semantics=("parallel",),
            vmem_limit_bytes=vmem_limit,
        ),
        cost_estimate=cost,
    )(x, w_padded, b_padded)


def intent_classifier(x, w_padded, b_padded, num_labels, *, block_m=512):
    """Original-module semantics: returns [B, num_labels] logits.

    Perf note: the [:, :num_labels] slice is an extra pass over the logits;
    performance-critical consumers (softmax / argmax) should consume the padded
    [B, LP] output of intent_classifier_padded directly, or be fused into the
    kernel epilogue, to avoid round-tripping the padding through HBM.
    """
    out_padded = intent_classifier_padded(x, w_padded, b_padded, block_m=block_m)
    return out_padded[:, :num_labels]


if __name__ == "__main__":
    # Shapes implied by the module: batch=8, input_dim=32, num_intent_labels=8.
    B, D, L = 8, 32, 8
    key = jax.random.PRNGKey(0)
    kx, kw, kb = jax.random.split(key, 3)

    x = jax.random.normal(kx, (B, D), dtype=jnp.float32)
    # Deterministic "Kaiming-uniform-ish" init matching nn.Linear param shapes.
    bound = 1.0 / (D ** 0.5)
    weight = jax.random.uniform(kw, (L, D), minval=-bound, maxval=bound,
                                dtype=jnp.float32)
    bias = jax.random.uniform(kb, (L,), minval=-bound, maxval=bound,
                              dtype=jnp.float32)

    # One-time parameter prep (label padding + bf16 cast) -- not per-call.
    w_p, b_p = prepare_params(weight, bias)

    out = intent_classifier(x, w_p, b_p, L)
    jax.block_until_ready(out)

    # Reference with matching numerics: bf16 operands, f32 accumulation,
    # f32 bias add (dropout p=0.0 is the identity).
    x_q = x.astype(jnp.bfloat16)
    ref = jnp.dot(x_q, w_p[:L, :].T, preferred_element_type=jnp.float32) + bias

    assert out.shape == (B, L)
    assert out.dtype == x.dtype
    assert jnp.allclose(out, ref, atol=1e-4, rtol=1e-4)
    print("KERNEL_OK")
</pallas_src>

<mosaic_0001>
module attributes {stable_mosaic.version = 11 : i64} {
  func.func @intent_classifier_kernel(%arg0: i32, %arg1: memref<8x32xf32, #tpu.memory_space<vmem>>, %arg2: memref<128x32xbf16, #tpu.memory_space<vmem>>, %arg3: memref<1x128xf32, #tpu.memory_space<vmem>>, %arg4: memref<8x128xf32, #tpu.memory_space<vmem>>) attributes {dimension_semantics = [#tpu.dimension_semantics<parallel>], iteration_bounds = array<i64: 1>, scalar_prefetch = 0 : i64, scratch_operands = 0 : i64, tpu.core_type = #tpu.core_type<tc>, window_params = [{transform_indices = @transform_0, window_bounds = array<i64: 8, 32>}, {pipeline_mode = #tpu.pipeline_mode<synchronous>, transform_indices = @transform_1, window_bounds = array<i64: 128, 32>}, {pipeline_mode = #tpu.pipeline_mode<synchronous>, transform_indices = @transform_2, window_bounds = array<i64: 1, 128>}, {transform_indices = @transform_3, window_bounds = array<i64: 8, 128>}]} {
    %c0 = arith.constant 0 : index
    %c0_0 = arith.constant 0 : index
    %0 = vector.load %arg1[%c0, %c0_0] : memref<8x32xf32, #tpu.memory_space<vmem>>, vector<8x32xf32>
    %c0_1 = arith.constant 0 : index
    %c0_2 = arith.constant 0 : index
    %1 = vector.load %arg2[%c0_1, %c0_2] : memref<128x32xbf16, #tpu.memory_space<vmem>>, vector<128x32xbf16>
    %2 = arith.truncf %0 : vector<8x32xf32> to vector<8x32xbf16>
    %cst = arith.constant dense<0.000000e+00> : vector<8x128xf32>
    %3 = tpu.matmul %2, %1, %cst {dimension_numbers = #tpu.dot_dimension_numbers<[1], [1], [0], [0], [0, 0, 1, 0], [], []>} : vector<8x32xbf16>, vector<128x32xbf16>, vector<8x128xf32> -> vector<8x128xf32>
    %c0_3 = arith.constant 0 : index
    %c0_4 = arith.constant 0 : index
    %4 = vector.load %arg3[%c0_3, %c0_4] : memref<1x128xf32, #tpu.memory_space<vmem>>, vector<1x128xf32>
    %5 = vector.broadcast %4 : vector<1x128xf32> to vector<8x128xf32>
    %6 = arith.addf %3, %5 : vector<8x128xf32>
    %c0_5 = arith.constant 0 : index
    %c0_6 = arith.constant 0 : index
    %7 = vector.load %arg4[%c0_5, %c0_6] : memref<8x128xf32, #tpu.memory_space<vmem>>, vector<8x128xf32>
    tpu.vector_store %arg4[%c0_5, %c0_6], %6 {strides = array<i32>} : memref<8x128xf32, #tpu.memory_space<vmem>>, vector<8x128xf32>,
    return
  }
  func.func @transform_0(%arg0: i32) -> (i32, i32) {
    %c0_i32 = arith.constant 0 : i32
    %c0_i32_0 = arith.constant 0 : i32
    return %arg0, %c0_i32 : i32, i32
  }
  func.func @transform_1(%arg0: i32) -> (i32, i32) {
    %c0_i32 = arith.constant 0 : i32
    %c0_i32_0 = arith.constant 0 : i32
    %c0_i32_1 = arith.constant 0 : i32
    return %c0_i32, %c0_i32_0 : i32, i32
  }
  func.func @transform_2(%arg0: i32) -> (i32, i32) {
    %c0_i32 = arith.constant 0 : i32
    %c0_i32_0 = arith.constant 0 : i32
    %c0_i32_1 = arith.constant 0 : i32
    return %c0_i32, %c0_i32_0 : i32, i32
  }
  func.func @transform_3(%arg0: i32) -> (i32, i32) {
    %c0_i32 = arith.constant 0 : i32
    %c0_i32_0 = arith.constant 0 : i32
    return %arg0, %c0_i32 : i32, i32
  }
}

</mosaic_0001>

<bundles_post_ra>
// kernel: intent_classifier_padded.1
= control target key start
LH: loop header
LB: loop body
LE: loop exit
PB: predicated region body
PF: predicated region fallthrough
CT: control target
= control target key end

     0   :  { %v236_v1 = vmov 0.0   ;;  %vm81_vm0 = vcmask 261120   ;;  %vm237_vm1 = vmmov 0   ;;  %s301_s0 = inlined_call_operand.vmem [shape: f32[8,32], index: 0, kind: input, shape index: {}]   ;;  %s302_s1 = inlined_call_operand.vmem [shape: bf16[128,32], index: 1, kind: input, shape index: {}]   ;;  %s303_s2 = inlined_call_operand.vmem [shape: f32[1,128], index: 2, kind: input, shape index: {}]   ;;  %s304_s3 = inlined_call_operand.hbm [shape: f32[8,128], index: 3, kind: output, shape index: {}]  }
   0x1   :  { %v206_v0 = vld [vmem:[%s302_s1 + $0x38] sm:$0xff]   ;;  %183 = vmatprep.subr.bf16.mxu0 %v236_v1  ;;  %v207_v3 = vld [vmem:[%s302_s1 + $0x30] sm:$0xff]   ;;  %199 = vmatprep.mubr.msk.bf16.mxu0 %vm237_vm1, %v236_v1 }
   0x2   :  { %v107_v2 = vsel %vm81_vm0, %v206_v0, 0  ;;  %v104_v4 = vsel %vm81_vm0, %v207_v3, 0 }
   0x3   :  { %184 = vmatpush3.bf16.xpose.msra.mxu0 %v107_v2 }
   0x4   :  { %185 = vmatprep.subr.bf16.mxu0 %v236_v1 }
   0x5   :  { %8 = vsyncpa [#allocation3], 0  ;;  %v208_v5 = vld [vmem:[%s302_s1 + $0x28] sm:$0xff]   ;;  %v209_v7 = vld [vmem:[%s302_s1 + $0x20] sm:$0xff]   ;;  %s238_s5 = smov [#allocation2]  }
   0x6   :  { %v101_v6 = vsel %vm81_vm0, %v208_v5, 0  ;;  %v98_v8 = vsel %vm81_vm0, %v209_v7, 0  ;;  %v210_v9 = vld [vmem:[%s302_s1 + $0x18] sm:$0xff]   ;;  %v211_v11 = vld [vmem:[%s302_s1 + $0x10] sm:$0xff]   ;;  %v212_v13 = vld [vmem:[%s302_s1 + $0x8] sm:$0xff]   ;;  %s156_s6 = sshll.u32 %s238_s5, 4  ;;  %s157_s6 = int_to_ptr.vmem [resolvable:$true] %s156_s6 }
   0x7   :  { %v95_v10 = vsel %vm81_vm0, %v210_v9, 0  ;;  %v92_v12 = vsel %vm81_vm0, %v211_v11, 0  ;;  %v89_v14 = vsel %vm81_vm0, %v212_v13, 0  ;;  %v213_v15 = vld [vmem:[%s302_s1] sm:$0xff]   ;;  %s214_s1 = scalar_lea.vmem %s157_s6, 128  ;;  %p219_p1 = scmp.lt.s32.totalorder %s157_s6, %s157_s6 }
   0x8   :  { %v86_v16 = vsel %vm81_vm0, %v213_v15, 0  ;;  %v16_v17 = vld [vmem:[%s301_s0] sm:$0xff]  ;;  %p215_p0 = scmp.ne.s32.totalorder %s157_s6, %s214_s1  ;;  %p220_p2 = scmp.lt.s32.totalorder %s214_s1, %s214_s1 }
   0x9   :  { %v33_v18 = vpack.c.bf16 %v16_v17, %v16_v17  ;;  %v164_v19 = vld [vmem:[%s303_s2] ss:$0 sm:$0xff] }
   0xa   :  { %p221_p3 = por %p220_p2, %p219_p1 }
   0xb   :  { %186 = vmatpush3.bf16.xpose.msra.mxu0 %v104_v4 }
   0xc   :  { %187 = vmatprep.subr.bf16.mxu0 %v236_v1  ;;  %p222_p4 = pnand %p221_p3, %p215_p0 }
  0x13   :  { %188 = vmatpush3.bf16.xpose.msra.mxu0 %v101_v6 }
  0x14   :  { %189 = vmatprep.subr.bf16.mxu0 %v236_v1 }
  0x1b   :  { %190 = vmatpush3.bf16.xpose.msra.mxu0 %v98_v8 }
  0x1c   :  { %191 = vmatprep.subr.bf16.mxu0 %v236_v1 }
  0x23   :  { %192 = vmatpush3.bf16.xpose.msra.mxu0 %v95_v10 }
  0x24   :  { %193 = vmatprep.subr.bf16.mxu0 %v236_v1 }
  0x2b   :  { %194 = vmatpush3.bf16.xpose.msra.mxu0 %v92_v12 }
  0x2c   :  { %195 = vmatprep.subr.bf16.mxu0 %v236_v1 }
  0x33   :  { %196 = vmatpush3.bf16.xpose.msra.mxu0 %v89_v14 }
  0x34   :  { %197 = vmatprep.subr.bf16.mxu0 %v236_v1 }
  0x3b   :  { %198 = vmatpush3.bf16.xpose.msra.mxu0 %v86_v16 }
  0x42   :  { %200 = vmatmul.mubr.msk.bf16.vlgmr.msra.gmra.mxu0 %vm81_vm0, %v33_v18 }
 0x102   :  { %v143_v20 = vpop.f32.mrf.mxu0 }
 0x103   :  { %v144_v21 = vadd.f32 %v164_v19, %v143_v20 }
 0x104   :  { %v201_v22 = vpop.f32.mrf.mxu0 }
 0x105   :  { %149 = vst [vmem:[#allocation2] sm:$0xff] %v144_v21 }
 0x106   :  { %v146_v23 = vpop.f32.mrf.mxu0 }
 0x107   :  { %225 = shalt.err (!%p222_p4)
}
 0x108   :  { %159 = dma.vmem_to_hbm [thread:$0]  %s157_s6, 128, %s304_s3, [#allocation3]   ;;  %v202_v24 = vpop.f32.mrf.mxu0 }
 0x109   :  { %234 = dma.done.wait [#allocation3], 128  }
 0x10a   :  { %235 = vsyncadd [#allocation3], 4294967168 }
 0x10b   :  { %163 = vsyncpa [#allocation3], 1 }

</bundles_post_ra>
